<compile_context>
chip_gen: v7x
topology: tpu7x:2x2x1
jax: 0.10.0
libtpu: 0.0.40
codegen_flags: <defaults>
</compile_context>

<pallas_src>
import jax
import jax.numpy as jnp
from jax.experimental import pallas as pl
from jax.experimental.pallas import tpu as pltpu

STRIDE = 4
C_IN = 4
C1 = 8
C2 = 16
NUM_CLASSES = 4
LANES = 128          # zero-padded output-channel width (lane-dense MXU output / stores)


# ----------------------------------------------------------------------------
# Kernels
# ----------------------------------------------------------------------------
def _conv_s2d_relu_kernel(x_ref, w_ref, b_ref, o_ref):
    """One image: 2x2 stride-1 conv (== space-to-depth'ed 3x3 stride-2 conv) + bias + ReLU.

    x_ref: (1, Ho+1, Wo+1, Cs)  f32   s2d input tile
    w_ref: (4, Cs, LANES)       bf16  per-tap weight slab (zero-padded lanes)
    b_ref: (1, LANES)           f32   bias (zero-padded)
    o_ref: (1, Ho, Wo, LANES)   f32
    """
    Ho, Wo = o_ref.shape[1], o_ref.shape[2]
    w = w_ref[...]                                            # (4, Cs, LANES) bf16
    bias = jnp.broadcast_to(b_ref[...], (Wo, LANES))          # hoisted out of the loops
    for a in range(Ho):                                       # static unroll over output rows
        acc = bias
        for ka in range(2):
            for kb in range(2):
                patch = x_ref[0, a + ka, kb:kb + Wo, :].astype(jnp.bfloat16)   # (Wo, Cs)
                acc = acc + jnp.dot(patch, w[2 * ka + kb],
                                    preferred_element_type=jnp.float32)
        o_ref[0, a, :, :] = jnp.maximum(acc, 0.0)


def _conv_s2d_head_kernel(x_ref, w_ref, b_ref, wh_ref, bh_ref, o_ref):
    """One image: (2x2 s1 conv == s2d'ed 3x3 s2 conv) + ReLU, fused 1x1 head + sigmoid."""
    Ho, Wo = o_ref.shape[1], o_ref.shape[2]
    w = w_ref[...]                                            # (4, Cs, LANES)  bf16
    wh = wh_ref[...]                                          # (LANES, LANES)  bf16
    b2 = jnp.broadcast_to(b_ref[...], (Wo, LANES))
    bh = jnp.broadcast_to(bh_ref[...], (Wo, LANES))
    for a in range(Ho):
        acc = b2
        for ka in range(2):
            for kb in range(2):
                patch = x_ref[0, a + ka, kb:kb + Wo, :].astype(jnp.bfloat16)   # (Wo, Cs)
                acc = acc + jnp.dot(patch, w[2 * ka + kb],
                                    preferred_element_type=jnp.float32)
        feat = jnp.maximum(acc, 0.0).astype(jnp.bfloat16)     # conv2 + ReLU, (Wo, LANES)
        logits = bh + jnp.dot(feat, wh, preferred_element_type=jnp.float32)
        # numerically-stable sigmoid: exp on the EUP, approx reciprocal (free EUP slot)
        e = jnp.exp(-jnp.abs(logits))
        r = pl.reciprocal(1.0 + e, approx=True)
        o_ref[0, a, :, :] = jnp.where(logits >= 0.0, r, e * r)


# ----------------------------------------------------------------------------
# pallas_call wrappers
# ----------------------------------------------------------------------------
def _conv1_call(y_s2d, w_taps, b_pad):
    n, a, b, cs = y_s2d.shape
    ho, wo = a - 1, b - 1
    flops = n * ho * 4 * 2 * wo * cs * LANES
    bytes_accessed = (y_s2d.size * 4 + w_taps.size * 2 + b_pad.size * 4
                      + n * ho * wo * LANES * 4)
    return pl.pallas_call(
        _conv_s2d_relu_kernel,
        out_shape=jax.ShapeDtypeStruct((n, ho, wo, LANES), jnp.float32),
        grid=(n,),
        in_specs=[
            pl.BlockSpec((1, a, b, cs), lambda i: (i, 0, 0, 0)),
            pl.BlockSpec((4, cs, LANES), lambda i: (0, 0, 0)),
            pl.BlockSpec((1, LANES), lambda i: (0, 0)),
        ],
        out_specs=pl.BlockSpec((1, ho, wo, LANES), lambda i: (i, 0, 0, 0)),
        compiler_params=pltpu.CompilerParams(
            dimension_semantics=("parallel",),
            vmem_limit_bytes=32 * 1024 * 1024,
        ),
        cost_estimate=pl.CostEstimate(flops=flops, transcendentals=0,
                                      bytes_accessed=bytes_accessed),
    )(y_s2d, w_taps, b_pad)


def _conv2_head_call(y_s2d, w_taps, b_pad, wh_pad, bh_pad):
    n, a, b, cs = y_s2d.shape
    ho, wo = a - 1, b - 1
    flops = n * ho * (4 * 2 * wo * cs * LANES + 2 * wo * LANES * LANES)
    transcendentals = n * ho * wo * LANES
    bytes_accessed = (y_s2d.size * 4 + w_taps.size * 2 + wh_pad.size * 2
                      + (b_pad.size + bh_pad.size) * 4 + n * ho * wo * LANES * 4)
    return pl.pallas_call(
        _conv_s2d_head_kernel,
        out_shape=jax.ShapeDtypeStruct((n, ho, wo, LANES), jnp.float32),
        grid=(n,),
        in_specs=[
            pl.BlockSpec((1, a, b, cs), lambda i: (i, 0, 0, 0)),
            pl.BlockSpec((4, cs, LANES), lambda i: (0, 0, 0)),
            pl.BlockSpec((1, LANES), lambda i: (0, 0)),
            pl.BlockSpec((LANES, LANES), lambda i: (0, 0)),
            pl.BlockSpec((1, LANES), lambda i: (0, 0)),
        ],
        out_specs=pl.BlockSpec((1, ho, wo, LANES), lambda i: (i, 0, 0, 0)),
        compiler_params=pltpu.CompilerParams(
            dimension_semantics=("parallel",),
            vmem_limit_bytes=32 * 1024 * 1024,
        ),
        cost_estimate=pl.CostEstimate(flops=flops, transcendentals=transcendentals,
                                      bytes_accessed=bytes_accessed),
    )(y_s2d, w_taps, b_pad, wh_pad, bh_pad)


# ----------------------------------------------------------------------------
# Wrapper-side relayouts (zero data inflation) and parameter preparation
# ----------------------------------------------------------------------------
def _pad_and_s2d(x_nhwc, pad):
    """Zero-pad spatially then space-to-depth by 2: (N,H,W,C) -> (N,(H+2p)/2,(W+2p)/2,4C).

    Channel ordering of the 4C axis is (p, q, c) with p/q the row/col phase."""
    n, h, w, c = x_nhwc.shape
    xp = jnp.pad(x_nhwc, ((0, 0), (pad, pad), (pad, pad), (0, 0)))
    hp, wp = h + 2 * pad, w + 2 * pad
    y = xp.reshape(n, hp // 2, 2, wp // 2, 2, c)
    y = y.transpose(0, 1, 3, 2, 4, 5).reshape(n, hp // 2, wp // 2, 4 * c)
    return y


def _s2d_conv_weight(w_hwio):
    """(3,3,Cin,Cout) -> (4, 4*Cin, LANES) bf16 per-tap slab for the s2d formulation.

    w_taps[ka*2+kb, p*2*Cin + q*Cin + c, o] = w[2ka+p, 2kb+q, c, o]
    (zero where the 3x3 kernel has no tap; zero-padded to LANES output channels)."""
    kh, kw, cin, cout = w_hwio.shape
    w4 = jnp.zeros((4, 4, cin, cout), w_hwio.dtype).at[:kh, :kw].set(w_hwio)
    w4 = w4.reshape(2, 2, 2, 2, cin, cout).transpose(0, 2, 1, 3, 4, 5)   # (ka,kb,p,q,c,o)
    wt = w4.reshape(4, 4 * cin, cout)
    wt = jnp.pad(wt, ((0, 0), (0, 0), (0, LANES - cout)))
    return wt.astype(jnp.bfloat16)


def _pad_bias(b):
    return jnp.pad(b, (0, LANES - b.shape[0])).reshape(1, LANES).astype(jnp.float32)


def _prepare_params(params):
    wh = params["wh"][0, 0]                                   # (C2, NUM_CLASSES)
    whp = jnp.pad(wh, ((0, LANES - wh.shape[0]), (0, LANES - wh.shape[1])))
    return {
        "w1t": _s2d_conv_weight(params["w1"]),
        "b1p": _pad_bias(params["b1"]),
        "w2t": _s2d_conv_weight(params["w2"]),
        "b2p": _pad_bias(params["b2"]),
        "whp": whp.astype(jnp.bfloat16),
        "bhp": _pad_bias(params["bh"]),
    }


# ----------------------------------------------------------------------------
# Detector (JAX/Pallas mirror of the PyTorch module)
# ----------------------------------------------------------------------------
class Detector:
    stride = STRIDE

    def __init__(self, params, training=True):
        assert hasattr(self, "stride"), "stride is necessary"
        self.training = training
        self.prep = _prepare_params(params)

    # --- backbone: conv1 (3x3, stride 2, pad 1) + ReLU ------------------------
    def extractor(self, x_nhwc):
        y1 = _pad_and_s2d(x_nhwc, 1)
        return _conv1_call(y1, self.prep["w1t"], self.prep["b1p"])[..., :C1]

    # --- head: conv2 (3x3, s2, p1) + ReLU and 1x1 conv + sigmoid (one fused kernel)
    def _forward(self, feats_nhwc):
        y2 = _pad_and_s2d(feats_nhwc, 1)
        out = _conv2_head_call(y2, self.prep["w2t"], self.prep["b2p"],
                               self.prep["whp"], self.prep["bhp"])
        return out[..., :NUM_CLASSES]

    def check_output(self, x, y):
        assert x.shape[2] // self.stride == y.shape[2], \
            f"stride={self.stride} doesn't match {x.shape[2]} => {y.shape[2]}"
        assert x.shape[3] // self.stride == y.shape[3], \
            f"stride={self.stride} doesn't match {x.shape[3]} => {y.shape[3]}"

    def forward(self, x_nchw):
        x = jnp.transpose(x_nchw, (0, 2, 3, 1))     # NCHW -> NHWC for the TPU kernels
        outs = self.extractor(x)
        y = self._forward(outs)
        y = jnp.transpose(y, (0, 3, 1, 2))          # back to NCHW
        if self.training:
            self.check_output(x_nchw, y)
        return y

    __call__ = forward


# ----------------------------------------------------------------------------
# Deterministic parameters + pure-JAX reference for validation
# ----------------------------------------------------------------------------
def init_params(key):
    k1, k2, k3 = jax.random.split(key, 3)
    return {
        "w1": 0.1 * jax.random.normal(k1, (3, 3, C_IN, C1), jnp.float32),
        "b1": jnp.zeros((C1,), jnp.float32),
        "w2": 0.1 * jax.random.normal(k2, (3, 3, C1, C2), jnp.float32),
        "b2": jnp.zeros((C2,), jnp.float32),
        "wh": 0.1 * jax.random.normal(k3, (1, 1, C2, NUM_CLASSES), jnp.float32),
        "bh": jnp.full((NUM_CLASSES,), -2.19, jnp.float32),   # CenterNet prior bias
    }


def reference_forward(params, x_nchw):
    """Pure-JAX (XLA conv) reference for numerical validation of the Pallas path."""
    def conv(x, w, b, stride, pad):
        y = jax.lax.conv_general_dilated(
            x, w, (stride, stride), ((pad, pad), (pad, pad)),
            dimension_numbers=("NHWC", "HWIO", "NHWC"))
        return y + b

    x = jnp.transpose(x_nchw, (0, 2, 3, 1))
    h = jax.nn.relu(conv(x, params["w1"], params["b1"], 2, 1))
    h = jax.nn.relu(conv(h, params["w2"], params["b2"], 2, 1))
    y = jax.nn.sigmoid(conv(h, params["wh"], params["bh"], 1, 0))
    return jnp.transpose(y, (0, 3, 1, 2))


if __name__ == "__main__":
    key = jax.random.PRNGKey(0)
    pkey, xkey = jax.random.split(key)

    params = init_params(pkey)
    detector = Detector(params, training=True)

    # input: NCHW, like the PyTorch module
    x = jax.random.normal(xkey, (2, C_IN, 16, 16), jnp.float32)

    y = jax.block_until_ready(detector(x))

    assert y.shape == (2, NUM_CLASSES, 16 // STRIDE, 16 // STRIDE), y.shape
    assert bool(jnp.all(jnp.isfinite(y)))

    # numerical check against a pure-JAX reference (bf16 MXU + approx reciprocal slack)
    y_ref = jax.block_until_ready(reference_forward(params, x))
    max_err = float(jnp.max(jnp.abs(y - y_ref)))
    assert max_err < 2e-2, f"max abs error vs reference = {max_err}"

    print("KERNEL_OK")
</pallas_src>

<mosaic_0001>
module attributes {stable_mosaic.version = 11 : i64} {
  func.func @_conv_s2d_relu_kernel(%arg0: i32, %arg1: memref<1x9x9x16xf32, #tpu.memory_space<vmem>>, %arg2: memref<4x16x128xbf16, #tpu.memory_space<vmem>>, %arg3: memref<1x128xf32, #tpu.memory_space<vmem>>, %arg4: memref<1x8x8x128xf32, #tpu.memory_space<vmem>>) attributes {dimension_semantics = [#tpu.dimension_semantics<parallel>], iteration_bounds = array<i64: 2>, scalar_prefetch = 0 : i64, scratch_operands = 0 : i64, tpu.core_type = #tpu.core_type<tc>, window_params = [{transform_indices = @transform_0, window_bounds = array<i64: 1, 9, 9, 16>}, {pipeline_mode = #tpu.pipeline_mode<synchronous>, transform_indices = @transform_1, window_bounds = array<i64: 4, 16, 128>}, {pipeline_mode = #tpu.pipeline_mode<synchronous>, transform_indices = @transform_2, window_bounds = array<i64: 1, 128>}, {transform_indices = @transform_3, window_bounds = array<i64: 1, 8, 8, 128>}]} {
    %c0 = arith.constant 0 : index
    %c0_0 = arith.constant 0 : index
    %c0_1 = arith.constant 0 : index
    %0 = vector.load %arg2[%c0, %c0_0, %c0_1] : memref<4x16x128xbf16, #tpu.memory_space<vmem>>, vector<4x16x128xbf16>
    %c0_2 = arith.constant 0 : index
    %c0_3 = arith.constant 0 : index
    %1 = vector.load %arg3[%c0_2, %c0_3] : memref<1x128xf32, #tpu.memory_space<vmem>>, vector<1x128xf32>
    %2 = vector.shape_cast %1 : vector<1x128xf32> to vector<1x128xf32>
    %3 = vector.broadcast %2 : vector<1x128xf32> to vector<8x128xf32>
    %c0_4 = arith.constant 0 : index
    %c0_5 = arith.constant 0 : index
    %c0_6 = arith.constant 0 : index
    %c0_7 = arith.constant 0 : index
    %4 = vector.load %arg1[%c0_4, %c0_5, %c0_6, %c0_7] : memref<1x9x9x16xf32, #tpu.memory_space<vmem>>, vector<1x1x8x16xf32>
    %5 = vector.shape_cast %4 : vector<1x1x8x16xf32> to vector<8x16xf32>
    %6 = arith.truncf %5 : vector<8x16xf32> to vector<8x16xbf16>
    %7 = vector.extract_strided_slice %0 {offsets = [0, 0, 0], sizes = [1, 16, 128], strides = [1, 1, 1]} : vector<4x16x128xbf16> to vector<1x16x128xbf16>
    %8 = vector.shape_cast %7 : vector<1x16x128xbf16> to vector<16x128xbf16>
    %cst = arith.constant dense<0.000000e+00> : vector<8x128xf32>
    %9 = tpu.matmul %6, %8, %cst {dimension_numbers = #tpu.dot_dimension_numbers<[1], [0], [0], [1], [0, 0, 1, 1], [], []>} : vector<8x16xbf16>, vector<16x128xbf16>, vector<8x128xf32> -> vector<8x128xf32>
    %10 = arith.addf %3, %9 : vector<8x128xf32>
    %c0_8 = arith.constant 0 : index
    %c0_9 = arith.constant 0 : index
    %c1 = arith.constant 1 : index
    %c0_10 = arith.constant 0 : index
    %11 = vector.load %arg1[%c0_8, %c0_9, %c1, %c0_10] : memref<1x9x9x16xf32, #tpu.memory_space<vmem>>, vector<1x1x8x16xf32>
    %12 = vector.shape_cast %11 : vector<1x1x8x16xf32> to vector<8x16xf32>
    %13 = arith.truncf %12 : vector<8x16xf32> to vector<8x16xbf16>
    %14 = vector.extract_strided_slice %0 {offsets = [1, 0, 0], sizes = [1, 16, 128], strides = [1, 1, 1]} : vector<4x16x128xbf16> to vector<1x16x128xbf16>
    %15 = vector.shape_cast %14 : vector<1x16x128xbf16> to vector<16x128xbf16>
    %cst_11 = arith.constant dense<0.000000e+00> : vector<8x128xf32>
    %16 = tpu.matmul %13, %15, %cst_11 {dimension_numbers = #tpu.dot_dimension_numbers<[1], [0], [0], [1], [0, 0, 1, 1], [], []>} : vector<8x16xbf16>, vector<16x128xbf16>, vector<8x128xf32> -> vector<8x128xf32>
    %17 = arith.addf %10, %16 : vector<8x128xf32>
    %c0_12 = arith.constant 0 : index
    %c1_13 = arith.constant 1 : index
    %c0_14 = arith.constant 0 : index
    %c0_15 = arith.constant 0 : index
    %18 = vector.load %arg1[%c0_12, %c1_13, %c0_14, %c0_15] : memref<1x9x9x16xf32, #tpu.memory_space<vmem>>, vector<1x1x8x16xf32>
    %19 = vector.shape_cast %18 : vector<1x1x8x16xf32> to vector<8x16xf32>
    %20 = arith.truncf %19 : vector<8x16xf32> to vector<8x16xbf16>
    %21 = vector.extract_strided_slice %0 {offsets = [2, 0, 0], sizes = [1, 16, 128], strides = [1, 1, 1]} : vector<4x16x128xbf16> to vector<1x16x128xbf16>
    %22 = vector.shape_cast %21 : vector<1x16x128xbf16> to vector<16x128xbf16>
    %cst_16 = arith.constant dense<0.000000e+00> : vector<8x128xf32>
    %23 = tpu.matmul %20, %22, %cst_16 {dimension_numbers = #tpu.dot_dimension_numbers<[1], [0], [0], [1], [0, 0, 1, 1], [], []>} : vector<8x16xbf16>, vector<16x128xbf16>, vector<8x128xf32> -> vector<8x128xf32>
    %24 = arith.addf %17, %23 : vector<8x128xf32>
    %c0_17 = arith.constant 0 : index
    %c1_18 = arith.constant 1 : index
    %c1_19 = arith.constant 1 : index
    %c0_20 = arith.constant 0 : index
    %25 = vector.load %arg1[%c0_17, %c1_18, %c1_19, %c0_20] : memref<1x9x9x16xf32, #tpu.memory_space<vmem>>, vector<1x1x8x16xf32>
    %26 = vector.shape_cast %25 : vector<1x1x8x16xf32> to vector<8x16xf32>
    %27 = arith.truncf %26 : vector<8x16xf32> to vector<8x16xbf16>
    %28 = vector.extract_strided_slice %0 {offsets = [3, 0, 0], sizes = [1, 16, 128], strides = [1, 1, 1]} : vector<4x16x128xbf16> to vector<1x16x128xbf16>
    %29 = vector.shape_cast %28 : vector<1x16x128xbf16> to vector<16x128xbf16>
    %cst_21 = arith.constant dense<0.000000e+00> : vector<8x128xf32>
    %30 = tpu.matmul %27, %29, %cst_21 {dimension_numbers = #tpu.dot_dimension_numbers<[1], [0], [0], [1], [0, 0, 1, 1], [], []>} : vector<8x16xbf16>, vector<16x128xbf16>, vector<8x128xf32> -> vector<8x128xf32>
    %31 = arith.addf %24, %30 : vector<8x128xf32>
    %cst_22 = arith.constant 0.000000e+00 : f32
    %32 = vector.broadcast %cst_22 : f32 to vector<8x128xf32>
    %33 = arith.maximumf %31, %32 : vector<8x128xf32>
    %c0_23 = arith.constant 0 : index
    %c0_24 = arith.constant 0 : index
    %c0_25 = arith.constant 0 : index
    %c0_26 = arith.constant 0 : index
    %34 = vector.load %arg4[%c0_23, %c0_24, %c0_25, %c0_26] : memref<1x8x8x128xf32, #tpu.memory_space<vmem>>, vector<1x1x8x128xf32>
    %35 = vector.shape_cast %34 : vector<1x1x8x128xf32> to vector<8x128xf32>
    %36 = vector.shape_cast %33 : vector<8x128xf32> to vector<1x1x8x128xf32>
    tpu.vector_store %arg4[%c0_23, %c0_24, %c0_25, %c0_26], %36 {strides = array<i32>} : memref<1x8x8x128xf32, #tpu.memory_space<vmem>>, vector<1x1x8x128xf32>,
    %c0_27 = arith.constant 0 : index
    %c1_28 = arith.constant 1 : index
    %c0_29 = arith.constant 0 : index
    %c0_30 = arith.constant 0 : index
    %37 = vector.load %arg1[%c0_27, %c1_28, %c0_29, %c0_30] : memref<1x9x9x16xf32, #tpu.memory_space<vmem>>, vector<1x1x8x16xf32>
    %38 = vector.shape_cast %37 : vector<1x1x8x16xf32> to vector<8x16xf32>
    %39 = arith.truncf %38 : vector<8x16xf32> to vector<8x16xbf16>
    %40 = vector.extract_strided_slice %0 {offsets = [0, 0, 0], sizes = [1, 16, 128], strides = [1, 1, 1]} : vector<4x16x128xbf16> to vector<1x16x128xbf16>
    %41 = vector.shape_cast %40 : vector<1x16x128xbf16> to vector<16x128xbf16>
    %cst_31 = arith.constant dense<0.000000e+00> : vector<8x128xf32>
    %42 = tpu.matmul %39, %41, %cst_31 {dimension_numbers = #tpu.dot_dimension_numbers<[1], [0], [0], [1], [0, 0, 1, 1], [], []>} : vector<8x16xbf16>, vector<16x128xbf16>, vector<8x128xf32> -> vector<8x128xf32>
    %43 = arith.addf %3, %42 : vector<8x128xf32>
    %c0_32 = arith.constant 0 : index
    %c1_33 = arith.constant 1 : index
    %c1_34 = arith.constant 1 : index
    %c0_35 = arith.constant 0 : index
    %44 = vector.load %arg1[%c0_32, %c1_33, %c1_34, %c0_35] : memref<1x9x9x16xf32, #tpu.memory_space<vmem>>, vector<1x1x8x16xf32>
    %45 = vector.shape_cast %44 : vector<1x1x8x16xf32> to vector<8x16xf32>
    %46 = arith.truncf %45 : vector<8x16xf32> to vector<8x16xbf16>
    %47 = vector.extract_strided_slice %0 {offsets = [1, 0, 0], sizes = [1, 16, 128], strides = [1, 1, 1]} : vector<4x16x128xbf16> to vector<1x16x128xbf16>
    %48 = vector.shape_cast %47 : vector<1x16x128xbf16> to vector<16x128xbf16>
    %cst_36 = arith.constant dense<0.000000e+00> : vector<8x128xf32>
    %49 = tpu.matmul %46, %48, %cst_36 {dimension_numbers = #tpu.dot_dimension_numbers<[1], [0], [0], [1], [0, 0, 1, 1], [], []>} : vector<8x16xbf16>, vector<16x128xbf16>, vector<8x128xf32> -> vector<8x128xf32>
    %50 = arith.addf %43, %49 : vector<8x128xf32>
    %c0_37 = arith.constant 0 : index
    %c2 = arith.constant 2 : index
    %c0_38 = arith.constant 0 : index
    %c0_39 = arith.constant 0 : index
    %51 = vector.load %arg1[%c0_37, %c2, %c0_38, %c0_39] : memref<1x9x9x16xf32, #tpu.memory_space<vmem>>, vector<1x1x8x16xf32>
    %52 = vector.shape_cast %51 : vector<1x1x8x16xf32> to vector<8x16xf32>
    %53 = arith.truncf %52 : vector<8x16xf32> to vector<8x16xbf16>
    %54 = vector.extract_strided_slice %0 {offsets = [2, 0, 0], sizes = [1, 16, 128], strides = [1, 1, 1]} : vector<4x16x128xbf16> to vector<1x16x128xbf16>
    %55 = vector.shape_cast %54 : vector<1x16x128xbf16> to vector<16x128xbf16>
    %cst_40 = arith.constant dense<0.000000e+00> : vector<8x128xf32>
    %56 = tpu.matmul %53, %55, %cst_40 {dimension_numbers = #tpu.dot_dimension_numbers<[1], [0], [0], [1], [0, 0, 1, 1], [], []>} : vector<8x16xbf16>, vector<16x128xbf16>, vector<8x128xf32> -> vector<8x128xf32>
    %57 = arith.addf %50, %56 : vector<8x128xf32>
    %c0_41 = arith.constant 0 : index
    %c2_42 = arith.constant 2 : index
    %c1_43 = arith.constant 1 : index
    %c0_44 = arith.constant 0 : index
    %58 = vector.load %arg1[%c0_41, %c2_42, %c1_43, %c0_44] : memref<1x9x9x16xf32, #tpu.memory_space<vmem>>, vector<1x1x8x16xf32>
    %59 = vector.shape_cast %58 : vector<1x1x8x16xf32> to vector<8x16xf32>
    %60 = arith.truncf %59 : vector<8x16xf32> to vector<8x16xbf16>
    %61 = vector.extract_strided_slice %0 {offsets = [3, 0, 0], sizes = [1, 16, 128], strides = [1, 1, 1]} : vector<4x16x128xbf16> to vector<1x16x128xbf16>
    %62 = vector.shape_cast %61 : vector<1x16x128xbf16> to vector<16x128xbf16>
    %cst_45 = arith.constant dense<0.000000e+00> : vector<8x128xf32>
    %63 = tpu.matmul %60, %62, %cst_45 {dimension_numbers = #tpu.dot_dimension_numbers<[1], [0], [0], [1], [0, 0, 1, 1], [], []>} : vector<8x16xbf16>, vector<16x128xbf16>, vector<8x128xf32> -> vector<8x128xf32>
    %64 = arith.addf %57, %63 : vector<8x128xf32>
    %cst_46 = arith.constant 0.000000e+00 : f32
    %65 = vector.broadcast %cst_46 : f32 to vector<8x128xf32>
    %66 = arith.maximumf %64, %65 : vector<8x128xf32>
    %c0_47 = arith.constant 0 : index
    %c1_48 = arith.constant 1 : index
    %c0_49 = arith.constant 0 : index
    %c0_50 = arith.constant 0 : index
    %67 = vector.load %arg4[%c0_47, %c1_48, %c0_49, %c0_50] : memref<1x8x8x128xf32, #tpu.memory_space<vmem>>, vector<1x1x8x128xf32>
    %68 = vector.shape_cast %67 : vector<1x1x8x128xf32> to vector<8x128xf32>
    %69 = vector.shape_cast %66 : vector<8x128xf32> to vector<1x1x8x128xf32>
    tpu.vector_store %arg4[%c0_47, %c1_48, %c0_49, %c0_50], %69 {strides = array<i32>} : memref<1x8x8x128xf32, #tpu.memory_space<vmem>>, vector<1x1x8x128xf32>,
    %c0_51 = arith.constant 0 : index
    %c2_52 = arith.constant 2 : index
    %c0_53 = arith.constant 0 : index
    %c0_54 = arith.constant 0 : index
    %70 = vector.load %arg1[%c0_51, %c2_52, %c0_53, %c0_54] : memref<1x9x9x16xf32, #tpu.memory_space<vmem>>, vector<1x1x8x16xf32>
    %71 = vector.shape_cast %70 : vector<1x1x8x16xf32> to vector<8x16xf32>
    %72 = arith.truncf %71 : vector<8x16xf32> to vector<8x16xbf16>
    %73 = vector.extract_strided_slice %0 {offsets = [0, 0, 0], sizes = [1, 16, 128], strides = [1, 1, 1]} : vector<4x16x128xbf16> to vector<1x16x128xbf16>
    %74 = vector.shape_cast %73 : vector<1x16x128xbf16> to vector<16x128xbf16>
    %cst_55 = arith.constant dense<0.000000e+00> : vector<8x128xf32>
    %75 = tpu.matmul %72, %74, %cst_55 {dimension_numbers = #tpu.dot_dimension_numbers<[1], [0], [0], [1], [0, 0, 1, 1], [], []>} : vector<8x16xbf16>, vector<16x128xbf16>, vector<8x128xf32> -> vector<8x128xf32>
    %76 = arith.addf %3, %75 : vector<8x128xf32>
    %c0_56 = arith.constant 0 : index
    %c2_57 = arith.constant 2 : index
    %c1_58 = arith.constant 1 : index
    %c0_59 = arith.constant 0 : index
    %77 = vector.load %arg1[%c0_56, %c2_57, %c1_58, %c0_59] : memref<1x9x9x16xf32, #tpu.memory_space<vmem>>, vector<1x1x8x16xf32>
    %78 = vector.shape_cast %77 : vector<1x1x8x16xf32> to vector<8x16xf32>
    %79 = arith.truncf %78 : vector<8x16xf32> to vector<8x16xbf16>
    %80 = vector.extract_strided_slice %0 {offsets = [1, 0, 0], sizes = [1, 16, 128], strides = [1, 1, 1]} : vector<4x16x128xbf16> to vector<1x16x128xbf16>
    %81 = vector.shape_cast %80 : vector<1x16x128xbf16> to vector<16x128xbf16>
    %cst_60 = arith.constant dense<0.000000e+00> : vector<8x128xf32>
    %82 = tpu.matmul %79, %81, %cst_60 {dimension_numbers = #tpu.dot_dimension_numbers<[1], [0], [0], [1], [0, 0, 1, 1], [], []>} : vector<8x16xbf16>, vector<16x128xbf16>, vector<8x128xf32> -> vector<8x128xf32>
    %83 = arith.addf %76, %82 : vector<8x128xf32>
    %c0_61 = arith.constant 0 : index
    %c3 = arith.constant 3 : index
    %c0_62 = arith.constant 0 : index
    %c0_63 = arith.constant 0 : index
    %84 = vector.load %arg1[%c0_61, %c3, %c0_62, %c0_63] : memref<1x9x9x16xf32, #tpu.memory_space<vmem>>, vector<1x1x8x16xf32>
    %85 = vector.shape_cast %84 : vector<1x1x8x16xf32> to vector<8x16xf32>
    %86 = arith.truncf %85 : vector<8x16xf32> to vector<8x16xbf16>
    %87 = vector.extract_strided_slice %0 {offsets = [2, 0, 0], sizes = [1, 16, 128], strides = [1, 1, 1]} : vector<4x16x128xbf16> to vector<1x16x128xbf16>
    %88 = vector.shape_cast %87 : vector<1x16x128xbf16> to vector<16x128xbf16>
    %cst_64 = arith.constant dense<0.000000e+00> : vector<8x128xf32>
    %89 = tpu.matmul %86, %88, %cst_64 {dimension_numbers = #tpu.dot_dimension_numbers<[1], [0], [0], [1], [0, 0, 1, 1], [], []>} : vector<8x16xbf16>, vector<16x128xbf16>, vector<8x128xf32> -> vector<8x128xf32>
    %90 = arith.addf %83, %89 : vector<8x128xf32>
    %c0_65 = arith.constant 0 : index
    %c3_66 = arith.constant 3 : index
    %c1_67 = arith.constant 1 : index
    %c0_68 = arith.constant 0 : index
    %91 = vector.load %arg1[%c0_65, %c3_66, %c1_67, %c0_68] : memref<1x9x9x16xf32, #tpu.memory_space<vmem>>, vector<1x1x8x16xf32>
    %92 = vector.shape_cast %91 : vector<1x1x8x16xf32> to vector<8x16xf32>
    %93 = arith.truncf %92 : vector<8x16xf32> to vector<8x16xbf16>
    %94 = vector.extract_strided_slice %0 {offsets = [3, 0, 0], sizes = [1, 16, 128], strides = [1, 1, 1]} : vector<4x16x128xbf16> to vector<1x16x128xbf16>
    %95 = vector.shape_cast %94 : vector<1x16x128xbf16> to vector<16x128xbf16>
    %cst_69 = arith.constant dense<0.000000e+00> : vector<8x128xf32>
    %96 = tpu.matmul %93, %95, %cst_69 {dimension_numbers = #tpu.dot_dimension_numbers<[1], [0], [0], [1], [0, 0, 1, 1], [], []>} : vector<8x16xbf16>, vector<16x128xbf16>, vector<8x128xf32> -> vector<8x128xf32>
    %97 = arith.addf %90, %96 : vector<8x128xf32>
    %cst_70 = arith.constant 0.000000e+00 : f32
    %98 = vector.broadcast %cst_70 : f32 to vector<8x128xf32>
    %99 = arith.maximumf %97, %98 : vector<8x128xf32>
    %c0_71 = arith.constant 0 : index
    %c2_72 = arith.constant 2 : index
    %c0_73 = arith.constant 0 : index
    %c0_74 = arith.constant 0 : index
    %100 = vector.load %arg4[%c0_71, %c2_72, %c0_73, %c0_74] : memref<1x8x8x128xf32, #tpu.memory_space<vmem>>, vector<1x1x8x128xf32>
    %101 = vector.shape_cast %100 : vector<1x1x8x128xf32> to vector<8x128xf32>
    %102 = vector.shape_cast %99 : vector<8x128xf32> to vector<1x1x8x128xf32>
    tpu.vector_store %arg4[%c0_71, %c2_72, %c0_73, %c0_74], %102 {strides = array<i32>} : memref<1x8x8x128xf32, #tpu.memory_space<vmem>>, vector<1x1x8x128xf32>,
    %c0_75 = arith.constant 0 : index
    %c3_76 = arith.constant 3 : index
    %c0_77 = arith.constant 0 : index
    %c0_78 = arith.constant 0 : index
    %103 = vector.load %arg1[%c0_75, %c3_76, %c0_77, %c0_78] : memref<1x9x9x16xf32, #tpu.memory_space<vmem>>, vector<1x1x8x16xf32>
    %104 = vector.shape_cast %103 : vector<1x1x8x16xf32> to vector<8x16xf32>
    %105 = arith.truncf %104 : vector<8x16xf32> to vector<8x16xbf16>
    %106 = vector.extract_strided_slice %0 {offsets = [0, 0, 0], sizes = [1, 16, 128], strides = [1, 1, 1]} : vector<4x16x128xbf16> to vector<1x16x128xbf16>
    %107 = vector.shape_cast %106 : vector<1x16x128xbf16> to vector<16x128xbf16>
    %cst_79 = arith.constant dense<0.000000e+00> : vector<8x128xf32>
    %108 = tpu.matmul %105, %107, %cst_79 {dimension_numbers = #tpu.dot_dimension_numbers<[1], [0], [0], [1], [0, 0, 1, 1], [], []>} : vector<8x16xbf16>, vector<16x128xbf16>, vector<8x128xf32> -> vector<8x128xf32>
    %109 = arith.addf %3, %108 : vector<8x128xf32>
    %c0_80 = arith.constant 0 : index
    %c3_81 = arith.constant 3 : index
    %c1_82 = arith.constant 1 : index
    %c0_83 = arith.constant 0 : index
    %110 = vector.load %arg1[%c0_80, %c3_81, %c1_82, %c0_83] : memref<1x9x9x16xf32, #tpu.memory_space<vmem>>, vector<1x1x8x16xf32>
    %111 = vector.shape_cast %110 : vector<1x1x8x16xf32> to vector<8x16xf32>
    %112 = arith.truncf %111 : vector<8x16xf32> to vector<8x16xbf16>
    %113 = vector.extract_strided_slice %0 {offsets = [1, 0, 0], sizes = [1, 16, 128], strides = [1, 1, 1]} : vector<4x16x128xbf16> to vector<1x16x128xbf16>
    %114 = vector.shape_cast %113 : vector<1x16x128xbf16> to vector<16x128xbf16>
    %cst_84 = arith.constant dense<0.000000e+00> : vector<8x128xf32>
    %115 = tpu.matmul %112, %114, %cst_84 {dimension_numbers = #tpu.dot_dimension_numbers<[1], [0], [0], [1], [0, 0, 1, 1], [], []>} : vector<8x16xbf16>, vector<16x128xbf16>, vector<8x128xf32> -> vector<8x128xf32>
    %116 = arith.addf %109, %115 : vector<8x128xf32>
    %c0_85 = arith.constant 0 : index
    %c4 = arith.constant 4 : index
    %c0_86 = arith.constant 0 : index
    %c0_87 = arith.constant 0 : index
    %117 = vector.load %arg1[%c0_85, %c4, %c0_86, %c0_87] : memref<1x9x9x16xf32, #tpu.memory_space<vmem>>, vector<1x1x8x16xf32>
    %118 = vector.shape_cast %117 : vector<1x1x8x16xf32> to vector<8x16xf32>
    %119 = arith.truncf %118 : vector<8x16xf32> to vector<8x16xbf16>
    %120 = vector.extract_strided_slice %0 {offsets = [2, 0, 0], sizes = [1, 16, 128], strides = [1, 1, 1]} : vector<4x16x128xbf16> to vector<1x16x128xbf16>
    %121 = vector.shape_cast %120 : vector<1x16x128xbf16> to vector<16x128xbf16>
    %cst_88 = arith.constant dense<0.000000e+00> : vector<8x128xf32>
    %122 = tpu.matmul %119, %121, %cst_88 {dimension_numbers = #tpu.dot_dimension_numbers<[1], [0], [0], [1], [0, 0, 1, 1], [], []>} : vector<8x16xbf16>, vector<16x128xbf16>, vector<8x128xf32> -> vector<8x128xf32>
    %123 = arith.addf %116, %122 : vector<8x128xf32>
    %c0_89 = arith.constant 0 : index
    %c4_90 = arith.constant 4 : index
    %c1_91 = arith.constant 1 : index
    %c0_92 = arith.constant 0 : index
    %124 = vector.load %arg1[%c0_89, %c4_90, %c1_91, %c0_92] : memref<1x9x9x16xf32, #tpu.memory_space<vmem>>, vector<1x1x8x16xf32>
    %125 = vector.shape_cast %124 : vector<1x1x8x16xf32> to vector<8x16xf32>
    %126 = arith.truncf %125 : vector<8x16xf32> to vector<8x16xbf16>
    %127 = vector.extract_strided_slice %0 {offsets = [3, 0, 0], sizes = [1, 16, 128], strides = [1, 1, 1]} : vector<4x16x128xbf16> to vector<1x16x128xbf16>
    %128 = vector.shape_cast %127 : vector<1x16x128xbf16> to vector<16x128xbf16>
    %cst_93 = arith.constant dense<0.000000e+00> : vector<8x128xf32>
    %129 = tpu.matmul %126, %128, %cst_93 {dimension_numbers = #tpu.dot_dimension_numbers<[1], [0], [0], [1], [0, 0, 1, 1], [], []>} : vector<8x16xbf16>, vector<16x128xbf16>, vector<8x128xf32> -> vector<8x128xf32>
    %130 = arith.addf %123, %129 : vector<8x128xf32>
    %cst_94 = arith.constant 0.000000e+00 : f32
    %131 = vector.broadcast %cst_94 : f32 to vector<8x128xf32>
    %132 = arith.maximumf %130, %131 : vector<8x128xf32>
    %c0_95 = arith.constant 0 : index
    %c3_96 = arith.constant 3 : index
    %c0_97 = arith.constant 0 : index
    %c0_98 = arith.constant 0 : index
    %133 = vector.load %arg4[%c0_95, %c3_96, %c0_97, %c0_98] : memref<1x8x8x128xf32, #tpu.memory_space<vmem>>, vector<1x1x8x128xf32>
    %134 = vector.shape_cast %133 : vector<1x1x8x128xf32> to vector<8x128xf32>
    %135 = vector.shape_cast %132 : vector<8x128xf32> to vector<1x1x8x128xf32>
    tpu.vector_store %arg4[%c0_95, %c3_96, %c0_97, %c0_98], %135 {strides = array<i32>} : memref<1x8x8x128xf32, #tpu.memory_space<vmem>>, vector<1x1x8x128xf32>,
    %c0_99 = arith.constant 0 : index
    %c4_100 = arith.constant 4 : index
    %c0_101 = arith.constant 0 : index
    %c0_102 = arith.constant 0 : index
    %136 = vector.load %arg1[%c0_99, %c4_100, %c0_101, %c0_102] : memref<1x9x9x16xf32, #tpu.memory_space<vmem>>, vector<1x1x8x16xf32>
    %137 = vector.shape_cast %136 : vector<1x1x8x16xf32> to vector<8x16xf32>
    %138 = arith.truncf %137 : vector<8x16xf32> to vector<8x16xbf16>
    %139 = vector.extract_strided_slice %0 {offsets = [0, 0, 0], sizes = [1, 16, 128], strides = [1, 1, 1]} : vector<4x16x128xbf16> to vector<1x16x128xbf16>
    %140 = vector.shape_cast %139 : vector<1x16x128xbf16> to vector<16x128xbf16>
    %cst_103 = arith.constant dense<0.000000e+00> : vector<8x128xf32>
    %141 = tpu.matmul %138, %140, %cst_103 {dimension_numbers = #tpu.dot_dimension_numbers<[1], [0], [0], [1], [0, 0, 1, 1], [], []>} : vector<8x16xbf16>, vector<16x128xbf16>, vector<8x128xf32> -> vector<8x128xf32>
    %142 = arith.addf %3, %141 : vector<8x128xf32>
    %c0_104 = arith.constant 0 : index
    %c4_105 = arith.constant 4 : index
    %c1_106 = arith.constant 1 : index
    %c0_107 = arith.constant 0 : index
    %143 = vector.load %arg1[%c0_104, %c4_105, %c1_106, %c0_107] : memref<1x9x9x16xf32, #tpu.memory_space<vmem>>, vector<1x1x8x16xf32>
    %144 = vector.shape_cast %143 : vector<1x1x8x16xf32> to vector<8x16xf32>
    %145 = arith.truncf %144 : vector<8x16xf32> to vector<8x16xbf16>
    %146 = vector.extract_strided_slice %0 {offsets = [1, 0, 0], sizes = [1, 16, 128], strides = [1, 1, 1]} : vector<4x16x128xbf16> to vector<1x16x128xbf16>
    %147 = vector.shape_cast %146 : vector<1x16x128xbf16> to vector<16x128xbf16>
    %cst_108 = arith.constant dense<0.000000e+00> : vector<8x128xf32>
    %148 = tpu.matmul %145, %147, %cst_108 {dimension_numbers = #tpu.dot_dimension_numbers<[1], [0], [0], [1], [0, 0, 1, 1], [], []>} : vector<8x16xbf16>, vector<16x128xbf16>, vector<8x128xf32> -> vector<8x128xf32>
    %149 = arith.addf %142, %148 : vector<8x128xf32>
    %c0_109 = arith.constant 0 : index
    %c5 = arith.constant 5 : index
    %c0_110 = arith.constant 0 : index
    %c0_111 = arith.constant 0 : index
    %150 = vector.load %arg1[%c0_109, %c5, %c0_110, %c0_111] : memref<1x9x9x16xf32, #tpu.memory_space<vmem>>, vector<1x1x8x16xf32>
    %151 = vector.shape_cast %150 : vector<1x1x8x16xf32> to vector<8x16xf32>
    %152 = arith.truncf %151 : vector<8x16xf32> to vector<8x16xbf16>
    %153 = vector.extract_strided_slice %0 {offsets = [2, 0, 0], sizes = [1, 16, 128], strides = [1, 1, 1]} : vector<4x16x128xbf16> to vector<1x16x128xbf16>
    %154 = vector.shape_cast %153 : vector<1x16x128xbf16> to vector<16x128xbf16>
    %cst_112 = arith.constant dense<0.000000e+00> : vector<8x128xf32>
    %155 = tpu.matmul %152, %154, %cst_112 {dimension_numbers = #tpu.dot_dimension_numbers<[1], [0], [0], [1], [0, 0, 1, 1], [], []>} : vector<8x16xbf16>, vector<16x128xbf16>, vector<8x128xf32> -> vector<8x128xf32>
    %156 = arith.addf %149, %155 : vector<8x128xf32>
    %c0_113 = arith.constant 0 : index
    %c5_114 = arith.constant 5 : index
    %c1_115 = arith.constant 1 : index
    %c0_116 = arith.constant 0 : index
    %157 = vector.load %arg1[%c0_113, %c5_114, %c1_115, %c0_116] : memref<1x9x9x16xf32, #tpu.memory_space<vmem>>, vector<1x1x8x16xf32>
    %158 = vector.shape_cast %157 : vector<1x1x8x16xf32> to vector<8x16xf32>
    %159 = arith.truncf %158 : vector<8x16xf32> to vector<8x16xbf16>
    %160 = vector.extract_strided_slice %0 {offsets = [3, 0, 0], sizes = [1, 16, 128], strides = [1, 1, 1]} : vector<4x16x128xbf16> to vector<1x16x128xbf16>
    %161 = vector.shape_cast %160 : vector<1x16x128xbf16> to vector<16x128xbf16>
    %cst_117 = arith.constant dense<0.000000e+00> : vector<8x128xf32>
    %162 = tpu.matmul %159, %161, %cst_117 {dimension_numbers = #tpu.dot_dimension_numbers<[1], [0], [0], [1], [0, 0, 1, 1], [], []>} : vector<8x16xbf16>, vector<16x128xbf16>, vector<8x128xf32> -> vector<8x128xf32>
    %163 = arith.addf %156, %162 : vector<8x128xf32>
    %cst_118 = arith.constant 0.000000e+00 : f32
    %164 = vector.broadcast %cst_118 : f32 to vector<8x128xf32>
    %165 = arith.maximumf %163, %164 : vector<8x128xf32>
    %c0_119 = arith.constant 0 : index
    %c4_120 = arith.constant 4 : index
    %c0_121 = arith.constant 0 : index
    %c0_122 = arith.constant 0 : index
    %166 = vector.load %arg4[%c0_119, %c4_120, %c0_121, %c0_122] : memref<1x8x8x128xf32, #tpu.memory_space<vmem>>, vector<1x1x8x128xf32>
    %167 = vector.shape_cast %166 : vector<1x1x8x128xf32> to vector<8x128xf32>
    %168 = vector.shape_cast %165 : vector<8x128xf32> to vector<1x1x8x128xf32>
    tpu.vector_store %arg4[%c0_119, %c4_120, %c0_121, %c0_122], %168 {strides = array<i32>} : memref<1x8x8x128xf32, #tpu.memory_space<vmem>>, vector<1x1x8x128xf32>,
    %c0_123 = arith.constant 0 : index
    %c5_124 = arith.constant 5 : index
    %c0_125 = arith.constant 0 : index
    %c0_126 = arith.constant 0 : index
    %169 = vector.load %arg1[%c0_123, %c5_124, %c0_125, %c0_126] : memref<1x9x9x16xf32, #tpu.memory_space<vmem>>, vector<1x1x8x16xf32>
    %170 = vector.shape_cast %169 : vector<1x1x8x16xf32> to vector<8x16xf32>
    %171 = arith.truncf %170 : vector<8x16xf32> to vector<8x16xbf16>
    %172 = vector.extract_strided_slice %0 {offsets = [0, 0, 0], sizes = [1, 16, 128], strides = [1, 1, 1]} : vector<4x16x128xbf16> to vector<1x16x128xbf16>
    %173 = vector.shape_cast %172 : vector<1x16x128xbf16> to vector<16x128xbf16>
    %cst_127 = arith.constant dense<0.000000e+00> : vector<8x128xf32>
    %174 = tpu.matmul %171, %173, %cst_127 {dimension_numbers = #tpu.dot_dimension_numbers<[1], [0], [0], [1], [0, 0, 1, 1], [], []>} : vector<8x16xbf16>, vector<16x128xbf16>, vector<8x128xf32> -> vector<8x128xf32>
    %175 = arith.addf %3, %174 : vector<8x128xf32>
    %c0_128 = arith.constant 0 : index
    %c5_129 = arith.constant 5 : index
    %c1_130 = arith.constant 1 : index
    %c0_131 = arith.constant 0 : index
    %176 = vector.load %arg1[%c0_128, %c5_129, %c1_130, %c0_131] : memref<1x9x9x16xf32, #tpu.memory_space<vmem>>, vector<1x1x8x16xf32>
    %177 = vector.shape_cast %176 : vector<1x1x8x16xf32> to vector<8x16xf32>
    %178 = arith.truncf %177 : vector<8x16xf32> to vector<8x16xbf16>
    %179 = vector.extract_strided_slice %0 {offsets = [1, 0, 0], sizes = [1, 16, 128], strides = [1, 1, 1]} : vector<4x16x128xbf16> to vector<1x16x128xbf16>
    %180 = vector.shape_cast %179 : vector<1x16x128xbf16> to vector<16x128xbf16>
    %cst_132 = arith.constant dense<0.000000e+00> : vector<8x128xf32>
    %181 = tpu.matmul %178, %180, %cst_132 {dimension_numbers = #tpu.dot_dimension_numbers<[1], [0], [0], [1], [0, 0, 1, 1], [], []>} : vector<8x16xbf16>, vector<16x128xbf16>, vector<8x128xf32> -> vector<8x128xf32>
    %182 = arith.addf %175, %181 : vector<8x128xf32>
    %c0_133 = arith.constant 0 : index
    %c6 = arith.constant 6 : index
    %c0_134 = arith.constant 0 : index
    %c0_135 = arith.constant 0 : index
    %183 = vector.load %arg1[%c0_133, %c6, %c0_134, %c0_135] : memref<1x9x9x16xf32, #tpu.memory_space<vmem>>, vector<1x1x8x16xf32>
    %184 = vector.shape_cast %183 : vector<1x1x8x16xf32> to vector<8x16xf32>
    %185 = arith.truncf %184 : vector<8x16xf32> to vector<8x16xbf16>
    %186 = vector.extract_strided_slice %0 {offsets = [2, 0, 0], sizes = [1, 16, 128], strides = [1, 1, 1]} : vector<4x16x128xbf16> to vector<1x16x128xbf16>
    %187 = vector.shape_cast %186 : vector<1x16x128xbf16> to vector<16x128xbf16>
    %cst_136 = arith.constant dense<0.000000e+00> : vector<8x128xf32>
    %188 = tpu.matmul %185, %187, %cst_136 {dimension_numbers = #tpu.dot_dimension_numbers<[1], [0], [0], [1], [0, 0, 1, 1], [], []>} : vector<8x16xbf16>, vector<16x128xbf16>, vector<8x128xf32> -> vector<8x128xf32>
    %189 = arith.addf %182, %188 : vector<8x128xf32>
    %c0_137 = arith.constant 0 : index
    %c6_138 = arith.constant 6 : index
    %c1_139 = arith.constant 1 : index
    %c0_140 = arith.constant 0 : index
    %190 = vector.load %arg1[%c0_137, %c6_138, %c1_139, %c0_140] : memref<1x9x9x16xf32, #tpu.memory_space<vmem>>, vector<1x1x8x16xf32>
    %191 = vector.shape_cast %190 : vector<1x1x8x16xf32> to vector<8x16xf32>
    %192 = arith.truncf %191 : vector<8x16xf32> to vector<8x16xbf16>
    %193 = vector.extract_strided_slice %0 {offsets = [3, 0, 0], sizes = [1, 16, 128], strides = [1, 1, 1]} : vector<4x16x128xbf16> to vector<1x16x128xbf16>
    %194 = vector.shape_cast %193 : vector<1x16x128xbf16> to vector<16x128xbf16>
    %cst_141 = arith.constant dense<0.000000e+00> : vector<8x128xf32>
    %195 = tpu.matmul %192, %194, %cst_141 {dimension_numbers = #tpu.dot_dimension_numbers<[1], [0], [0], [1], [0, 0, 1, 1], [], []>} : vector<8x16xbf16>, vector<16x128xbf16>, vector<8x128xf32> -> vector<8x128xf32>
    %196 = arith.addf %189, %195 : vector<8x128xf32>
    %cst_142 = arith.constant 0.000000e+00 : f32
    %197 = vector.broadcast %cst_142 : f32 to vector<8x128xf32>
    %198 = arith.maximumf %196, %197 : vector<8x128xf32>
    %c0_143 = arith.constant 0 : index
    %c5_144 = arith.constant 5 : index
    %c0_145 = arith.constant 0 : index
    %c0_146 = arith.constant 0 : index
    %199 = vector.load %arg4[%c0_143, %c5_144, %c0_145, %c0_146] : memref<1x8x8x128xf32, #tpu.memory_space<vmem>>, vector<1x1x8x128xf32>
    %200 = vector.shape_cast %199 : vector<1x1x8x128xf32> to vector<8x128xf32>
    %201 = vector.shape_cast %198 : vector<8x128xf32> to vector<1x1x8x128xf32>
    tpu.vector_store %arg4[%c0_143, %c5_144, %c0_145, %c0_146], %201 {strides = array<i32>} : memref<1x8x8x128xf32, #tpu.memory_space<vmem>>, vector<1x1x8x128xf32>,
    %c0_147 = arith.constant 0 : index
    %c6_148 = arith.constant 6 : index
    %c0_149 = arith.constant 0 : index
    %c0_150 = arith.constant 0 : index
    %202 = vector.load %arg1[%c0_147, %c6_148, %c0_149, %c0_150] : memref<1x9x9x16xf32, #tpu.memory_space<vmem>>, vector<1x1x8x16xf32>
    %203 = vector.shape_cast %202 : vector<1x1x8x16xf32> to vector<8x16xf32>
    %204 = arith.truncf %203 : vector<8x16xf32> to vector<8x16xbf16>
    %205 = vector.extract_strided_slice %0 {offsets = [0, 0, 0], sizes = [1, 16, 128], strides = [1, 1, 1]} : vector<4x16x128xbf16> to vector<1x16x128xbf16>
    %206 = vector.shape_cast %205 : vector<1x16x128xbf16> to vector<16x128xbf16>
    %cst_151 = arith.constant dense<0.000000e+00> : vector<8x128xf32>
    %207 = tpu.matmul %204, %206, %cst_151 {dimension_numbers = #tpu.dot_dimension_numbers<[1], [0], [0], [1], [0, 0, 1, 1], [], []>} : vector<8x16xbf16>, vector<16x128xbf16>, vector<8x128xf32> -> vector<8x128xf32>
    %208 = arith.addf %3, %207 : vector<8x128xf32>
    %c0_152 = arith.constant 0 : index
    %c6_153 = arith.constant 6 : index
    %c1_154 = arith.constant 1 : index
    %c0_155 = arith.constant 0 : index
    %209 = vector.load %arg1[%c0_152, %c6_153, %c1_154, %c0_155] : memref<1x9x9x16xf32, #tpu.memory_space<vmem>>, vector<1x1x8x16xf32>
    %210 = vector.shape_cast %209 : vector<1x1x8x16xf32> to vector<8x16xf32>
    %211 = arith.truncf %210 : vector<8x16xf32> to vector<8x16xbf16>
    %212 = vector.extract_strided_slice %0 {offsets = [1, 0, 0], sizes = [1, 16, 128], strides = [1, 1, 1]} : vector<4x16x128xbf16> to vector<1x16x128xbf16>
    %213 = vector.shape_cast %212 : vector<1x16x128xbf16> to vector<16x128xbf16>
    %cst_156 = arith.constant dense<0.000000e+00> : vector<8x128xf32>
    %214 = tpu.matmul %211, %213, %cst_156 {dimension_numbers = #tpu.dot_dimension_numbers<[1], [0], [0], [1], [0, 0, 1, 1], [], []>} : vector<8x16xbf16>, vector<16x128xbf16>, vector<8x128xf32> -> vector<8x128xf32>
    %215 = arith.addf %208, %214 : vector<8x128xf32>
    %c0_157 = arith.constant 0 : index
    %c7 = arith.constant 7 : index
    %c0_158 = arith.constant 0 : index
    %c0_159 = arith.constant 0 : index
    %216 = vector.load %arg1[%c0_157, %c7, %c0_158, %c0_159] : memref<1x9x9x16xf32, #tpu.memory_space<vmem>>, vector<1x1x8x16xf32>
    %217 = vector.shape_cast %216 : vector<1x1x8x16xf32> to vector<8x16xf32>
    %218 = arith.truncf %217 : vector<8x16xf32> to vector<8x16xbf16>
    %219 = vector.extract_strided_slice %0 {offsets = [2, 0, 0], sizes = [1, 16, 128], strides = [1, 1, 1]} : vector<4x16x128xbf16> to vector<1x16x128xbf16>
    %220 = vector.shape_cast %219 : vector<1x16x128xbf16> to vector<16x128xbf16>
    %cst_160 = arith.constant dense<0.000000e+00> : vector<8x128xf32>
    %221 = tpu.matmul %218, %220, %cst_160 {dimension_numbers = #tpu.dot_dimension_numbers<[1], [0], [0], [1], [0, 0, 1, 1], [], []>} : vector<8x16xbf16>, vector<16x128xbf16>, vector<8x128xf32> -> vector<8x128xf32>
    %222 = arith.addf %215, %221 : vector<8x128xf32>
    %c0_161 = arith.constant 0 : index
    %c7_162 = arith.constant 7 : index
    %c1_163 = arith.constant 1 : index
    %c0_164 = arith.constant 0 : index
    %223 = vector.load %arg1[%c0_161, %c7_162, %c1_163, %c0_164] : memref<1x9x9x16xf32, #tpu.memory_space<vmem>>, vector<1x1x8x16xf32>
    %224 = vector.shape_cast %223 : vector<1x1x8x16xf32> to vector<8x16xf32>
    %225 = arith.truncf %224 : vector<8x16xf32> to vector<8x16xbf16>
    %226 = vector.extract_strided_slice %0 {offsets = [3, 0, 0], sizes = [1, 16, 128], strides = [1, 1, 1]} : vector<4x16x128xbf16> to vector<1x16x128xbf16>
    %227 = vector.shape_cast %226 : vector<1x16x128xbf16> to vector<16x128xbf16>
    %cst_165 = arith.constant dense<0.000000e+00> : vector<8x128xf32>
    %228 = tpu.matmul %225, %227, %cst_165 {dimension_numbers = #tpu.dot_dimension_numbers<[1], [0], [0], [1], [0, 0, 1, 1], [], []>} : vector<8x16xbf16>, vector<16x128xbf16>, vector<8x128xf32> -> vector<8x128xf32>
    %229 = arith.addf %222, %228 : vector<8x128xf32>
    %cst_166 = arith.constant 0.000000e+00 : f32
    %230 = vector.broadcast %cst_166 : f32 to vector<8x128xf32>
    %231 = arith.maximumf %229, %230 : vector<8x128xf32>
    %c0_167 = arith.constant 0 : index
    %c6_168 = arith.constant 6 : index
    %c0_169 = arith.constant 0 : index
    %c0_170 = arith.constant 0 : index
    %232 = vector.load %arg4[%c0_167, %c6_168, %c0_169, %c0_170] : memref<1x8x8x128xf32, #tpu.memory_space<vmem>>, vector<1x1x8x128xf32>
    %233 = vector.shape_cast %232 : vector<1x1x8x128xf32> to vector<8x128xf32>
    %234 = vector.shape_cast %231 : vector<8x128xf32> to vector<1x1x8x128xf32>
    tpu.vector_store %arg4[%c0_167, %c6_168, %c0_169, %c0_170], %234 {strides = array<i32>} : memref<1x8x8x128xf32, #tpu.memory_space<vmem>>, vector<1x1x8x128xf32>,
    %c0_171 = arith.constant 0 : index
    %c7_172 = arith.constant 7 : index
    %c0_173 = arith.constant 0 : index
    %c0_174 = arith.constant 0 : index
    %235 = vector.load %arg1[%c0_171, %c7_172, %c0_173, %c0_174] : memref<1x9x9x16xf32, #tpu.memory_space<vmem>>, vector<1x1x8x16xf32>
    %236 = vector.shape_cast %235 : vector<1x1x8x16xf32> to vector<8x16xf32>
    %237 = arith.truncf %236 : vector<8x16xf32> to vector<8x16xbf16>
    %238 = vector.extract_strided_slice %0 {offsets = [0, 0, 0], sizes = [1, 16, 128], strides = [1, 1, 1]} : vector<4x16x128xbf16> to vector<1x16x128xbf16>
    %239 = vector.shape_cast %238 : vector<1x16x128xbf16> to vector<16x128xbf16>
    %cst_175 = arith.constant dense<0.000000e+00> : vector<8x128xf32>
    %240 = tpu.matmul %237, %239, %cst_175 {dimension_numbers = #tpu.dot_dimension_numbers<[1], [0], [0], [1], [0, 0, 1, 1], [], []>} : vector<8x16xbf16>, vector<16x128xbf16>, vector<8x128xf32> -> vector<8x128xf32>
    %241 = arith.addf %3, %240 : vector<8x128xf32>
    %c0_176 = arith.constant 0 : index
    %c7_177 = arith.constant 7 : index
    %c1_178 = arith.constant 1 : index
    %c0_179 = arith.constant 0 : index
    %242 = vector.load %arg1[%c0_176, %c7_177, %c1_178, %c0_179] : memref<1x9x9x16xf32, #tpu.memory_space<vmem>>, vector<1x1x8x16xf32>
    %243 = vector.shape_cast %242 : vector<1x1x8x16xf32> to vector<8x16xf32>
    %244 = arith.truncf %243 : vector<8x16xf32> to vector<8x16xbf16>
    %245 = vector.extract_strided_slice %0 {offsets = [1, 0, 0], sizes = [1, 16, 128], strides = [1, 1, 1]} : vector<4x16x128xbf16> to vector<1x16x128xbf16>
    %246 = vector.shape_cast %245 : vector<1x16x128xbf16> to vector<16x128xbf16>
    %cst_180 = arith.constant dense<0.000000e+00> : vector<8x128xf32>
    %247 = tpu.matmul %244, %246, %cst_180 {dimension_numbers = #tpu.dot_dimension_numbers<[1], [0], [0], [1], [0, 0, 1, 1], [], []>} : vector<8x16xbf16>, vector<16x128xbf16>, vector<8x128xf32> -> vector<8x128xf32>
    %248 = arith.addf %241, %247 : vector<8x128xf32>
    %c0_181 = arith.constant 0 : index
    %c8 = arith.constant 8 : index
    %c0_182 = arith.constant 0 : index
    %c0_183 = arith.constant 0 : index
    %249 = vector.load %arg1[%c0_181, %c8, %c0_182, %c0_183] : memref<1x9x9x16xf32, #tpu.memory_space<vmem>>, vector<1x1x8x16xf32>
    %250 = vector.shape_cast %249 : vector<1x1x8x16xf32> to vector<8x16xf32>
    %251 = arith.truncf %250 : vector<8x16xf32> to vector<8x16xbf16>
    %252 = vector.extract_strided_slice %0 {offsets = [2, 0, 0], sizes = [1, 16, 128], strides = [1, 1, 1]} : vector<4x16x128xbf16> to vector<1x16x128xbf16>
    %253 = vector.shape_cast %252 : vector<1x16x128xbf16> to vector<16x128xbf16>
    %cst_184 = arith.constant dense<0.000000e+00> : vector<8x128xf32>
    %254 = tpu.matmul %251, %253, %cst_184 {dimension_numbers = #tpu.dot_dimension_numbers<[1], [0], [0], [1], [0, 0, 1, 1], [], []>} : vector<8x16xbf16>, vector<16x128xbf16>, vector<8x128xf32> -> vector<8x128xf32>
    %255 = arith.addf %248, %254 : vector<8x128xf32>
    %c0_185 = arith.constant 0 : index
    %c8_186 = arith.constant 8 : index
    %c1_187 = arith.constant 1 : index
    %c0_188 = arith.constant 0 : index
    %256 = vector.load %arg1[%c0_185, %c8_186, %c1_187, %c0_188] : memref<1x9x9x16xf32, #tpu.memory_space<vmem>>, vector<1x1x8x16xf32>
    %257 = vector.shape_cast %256 : vector<1x1x8x16xf32> to vector<8x16xf32>
    %258 = arith.truncf %257 : vector<8x16xf32> to vector<8x16xbf16>
    %259 = vector.extract_strided_slice %0 {offsets = [3, 0, 0], sizes = [1, 16, 128], strides = [1, 1, 1]} : vector<4x16x128xbf16> to vector<1x16x128xbf16>
    %260 = vector.shape_cast %259 : vector<1x16x128xbf16> to vector<16x128xbf16>
    %cst_189 = arith.constant dense<0.000000e+00> : vector<8x128xf32>
    %261 = tpu.matmul %258, %260, %cst_189 {dimension_numbers = #tpu.dot_dimension_numbers<[1], [0], [0], [1], [0, 0, 1, 1], [], []>} : vector<8x16xbf16>, vector<16x128xbf16>, vector<8x128xf32> -> vector<8x128xf32>
    %262 = arith.addf %255, %261 : vector<8x128xf32>
    %cst_190 = arith.constant 0.000000e+00 : f32
    %263 = vector.broadcast %cst_190 : f32 to vector<8x128xf32>
    %264 = arith.maximumf %262, %263 : vector<8x128xf32>
    %c0_191 = arith.constant 0 : index
    %c7_192 = arith.constant 7 : index
    %c0_193 = arith.constant 0 : index
    %c0_194 = arith.constant 0 : index
    %265 = vector.load %arg4[%c0_191, %c7_192, %c0_193, %c0_194] : memref<1x8x8x128xf32, #tpu.memory_space<vmem>>, vector<1x1x8x128xf32>
    %266 = vector.shape_cast %265 : vector<1x1x8x128xf32> to vector<8x128xf32>
    %267 = vector.shape_cast %264 : vector<8x128xf32> to vector<1x1x8x128xf32>
    tpu.vector_store %arg4[%c0_191, %c7_192, %c0_193, %c0_194], %267 {strides = array<i32>} : memref<1x8x8x128xf32, #tpu.memory_space<vmem>>, vector<1x1x8x128xf32>,
    return
  }
  func.func @transform_0(%arg0: i32) -> (i32, i32, i32, i32) {
    %c0_i32 = arith.constant 0 : i32
    %c0_i32_0 = arith.constant 0 : i32
    %c0_i32_1 = arith.constant 0 : i32
    %c0_i32_2 = arith.constant 0 : i32
    return %arg0, %c0_i32, %c0_i32_0, %c0_i32_1 : i32, i32, i32, i32
  }
  func.func @transform_1(%arg0: i32) -> (i32, i32, i32) {
    %c0_i32 = arith.constant 0 : i32
    %c0_i32_0 = arith.constant 0 : i32
    %c0_i32_1 = arith.constant 0 : i32
    %c0_i32_2 = arith.constant 0 : i32
    return %c0_i32, %c0_i32_0, %c0_i32_1 : i32, i32, i32
  }
  func.func @transform_2(%arg0: i32) -> (i32, i32) {
    %c0_i32 = arith.constant 0 : i32
    %c0_i32_0 = arith.constant 0 : i32
    %c0_i32_1 = arith.constant 0 : i32
    return %c0_i32, %c0_i32_0 : i32, i32
  }
  func.func @transform_3(%arg0: i32) -> (i32, i32, i32, i32) {
    %c0_i32 = arith.constant 0 : i32
    %c0_i32_0 = arith.constant 0 : i32
    %c0_i32_1 = arith.constant 0 : i32
    %c0_i32_2 = arith.constant 0 : i32
    return %arg0, %c0_i32, %c0_i32_0, %c0_i32_1 : i32, i32, i32, i32
  }
}

</mosaic_0001>

<bundles_post_ra>
// kernel: tpu_custom_call.1
= control target key start
LH: loop header
LB: loop body
LE: loop exit
PB: predicated region body
PF: predicated region fallthrough
CT: control target
= control target key end

     0   :  { %8 = vsyncpa [#allocation3], 0  ;;  %s2693_s0 = inlined_call_operand.vmem [shape: f32[2,9,9,16], index: 0, kind: input, shape index: {}]   ;;  %s2694_s1 = inlined_call_operand.vmem [shape: bf16[4,16,128], index: 1, kind: input, shape index: {}]   ;;  %s2695_s2 = inlined_call_operand.vmem [shape: f32[1,128], index: 2, kind: input, shape index: {}]   ;;  %s2696_s3 = inlined_call_operand.hbm [shape: f32[2,8,8,128], index: 3, kind: output, shape index: {}]  }
   0x1   :  { %10 = vsyncpa [#allocation3 + $0x1], 0  ;;  %s2372_s12 = smov 0   ;;  %s2374_s13 = smov 0  }
   0x2   :  { %s2376_s14 = smov 0   ;;  %s2378_s15 = smov 0  }
   0x3 LB: > { %s2393_s16 = sadd.s32 4294967295, %s2345_s15   ;;  %s1789_s17 = sadd.s32 4294967294, %s2345_s15   ;;  %s2345_s15 = sphi %s2378_s15, %s2702_s15   ;;  %s2341_s14 = sphi %s2376_s14, %s2701_s14   ;;  %s2337_s13 = sphi %s2374_s13, %s2700_s13   ;;  %s2333_s12 = sphi %s2372_s12, %s2699_s12  }
   0x4   : > { %s2397_s18 = sadd.s32 1, %s2345_s15   ;;  %s91_s19 = sadd.s32 1, %s2341_s14 }
   0x5   : > { %s88_s20 = ssub.s32 %s2345_s15, %s2397_s18  ;;  %p101_p0 = scmp.ne.s32.totalorder %s2341_s14, %s2337_s13 }
   0x6   : > { %p89_p1 = scmp.eq.s32.totalorder %s88_s20, 0  ;;  %p102_p2 = scmp.eq.s32.totalorder %s2393_s16, 1 }
   0x7   : > { %p107_p3 = scmp.ne.s32.totalorder %s2337_s13, %s2333_s12  ;;  %p108_p4 = scmp.eq.s32.totalorder %s1789_s17, 1 }
   0x8   : > { %s2408_s21 = scalar_select %p89_p1, %s2341_s14, %s91_s19  }
   0x9   : > { %p2410_p5 = por %p102_p2, %p101_p0  ;;  %p2414_p6 = por %p108_p4, %p107_p3 }
   0xa   : > { %p1792_p7 = scmp.ge.s32.totalorder %s2345_s15, 1  ;;  %p140_p8 = scmp.lt.s32.totalorder %s2345_s15, 3 }
   0xc   : > { %p141_p9 = pnand %p1792_p7, %p140_p8 }
   0xd   : > { %v2423_v0 = vld [vmem:[%s2694_s1] sm:$0xff] (!%p141_p9)   ;;  %v2347_v1 = vmov (!%p141_p9), 0.0   ;;  %p164_p10 = scmp.lt.s32.totalorder (!%p141_p9), %s2393_s16, 1  ;;  %vm2348_vm0 = vmmov (!%p141_p9), 0   ;;  %vm193_vm1 = vcmask (!%p141_p9), 130048   ;;  %v2446_v3 = vld [vmem:[%s2694_s1 + $0x8] sm:$0xff] (!%p141_p9)  }
   0xe   : > { %144 = sbr.rel (%p141_p9) target bundleno = 428 (0x1ac), region = 32  ;;  %1939 = vmatprep.subr.bf16.mxu0 (!%p141_p9), %v2347_v1  ;;  %1963 = vmatprep.subr.bf16.mxu1 (!%p141_p9), %v2347_v1  ;;  %v2464_v11 = vld [vmem:[%s2694_s1 + $0x10] sm:$0xff] (!%p141_p9)   ;;  %v2480_v14 = vld [vmem:[%s2694_s1 + $0x18] sm:$0xff] (!%p141_p9)   ;;  %s161_s10 = sand.u32 (!%p141_p9), 1, %s2337_s13   ;;  %v1795_v41 = vld [vmem:[%s2695_s2] ss:$0 sm:$0xff] (!%p141_p9) }
   0xf   : > { %1940 = vmatpush3.bf16.msra.mxu0 (!%p141_p9), %v2423_v0  ;;  %1964 = vmatpush3.bf16.msra.mxu1 (!%p141_p9), %v2423_v0  ;;  %s1793_s19 = sshll.u32 (!%p141_p9), %s161_s10, 6  ;;  %s1874_s24 = sshll.u32 (!%p141_p9), %s2393_s16, 10 }
  0x10   : > { %1941 = vmatprep.mubr.msk.bf16.mxu0 (!%p141_p9), %vm2348_vm0, %v2347_v1  ;;  %1945 = vmatprep.subr.bf16.mxu0 (!%p141_p9), %v2347_v1  ;;  %s2631_s20 = scalar_lea.vmem (!%p141_p9), [#allocation2], %s1793_s19  ;;  %s2644_s28 = scalar_lea.hbm (!%p141_p9), %s2696_s3, %s1874_s24 }
  0x11   : > { %1965 = vmatprep.mubr.msk.bf16.mxu1 (!%p141_p9), %vm2348_vm0, %v2347_v1  ;;  %1969 = vmatprep.subr.bf16.mxu1 (!%p141_p9), %v2347_v1  ;;  %s1727_s25 = sshll.u32 (!%p141_p9), %s2631_s20, 4  ;;  %s2646_s25 = int_to_ptr.vmem [resolvable:$true] %s1727_s25 }
  0x12   : > { %s2283_s29 = scalar_lea.vmem (!%p141_p9), %s2646_s25, 1024 }
  0x13   : > { %p2284_p11 = scmp.ne.s32.totalorder (!%p141_p9), %s2646_s25, %s2283_s29 }
  0x15   : > { %s165_s26 = scalar_select %p164_p10, %s2393_s16, 1 }
  0x16   : > { %s2652_s16 = scalar_lea.sflag [#allocation3], %s161_s10  ;;  %p2285_p12 = pnand %p2284_p11, %p2410_p5 }
  0x17   : > { %s2235_s27 = smul.u32 144, %s165_s26 }
  0x18   : > { %p2286_p13 = pneg %p2285_p12 }
  0x19   : > { %s2440_s30 = scalar_lea.vmem %s2693_s0, %s2235_s27 }
  0x1a   : > { %v185_v2 = vld [vmem:[%s2440_s30] sm:$0xff]  ;;  %v1806_v4 = vld [vmem:[%s2440_s30 + $0x10] sm:$0xff] }
  0x1b   : > { %v186_v5 = vpack.c.bf16 %v185_v2, %v185_v2  ;;  %v398_v6 = vpack.c.bf16 %v1806_v4, %v1806_v4  ;;  %v238_v7 = vld [vmem:[%s2440_s30 + $0x1] sm:$0xff]  ;;  %v1808_v8 = vld [vmem:[%s2440_s30 + $0x11] sm:$0xff] }
  0x1c   : > { %v239_v9 = vpack.c.bf16 %v238_v7, %v238_v7  ;;  %v444_v10 = vpack.c.bf16 %v1808_v8, %v1808_v8  ;;  %v1810_v12 = vld [vmem:[%s2440_s30 + $0x20] sm:$0xff]  ;;  %v1824_v17 = vld [vmem:[%s2440_s30 + $0x30] sm:$0xff] }
  0x1d   : > { %1942 = vmatmul.mubr.msk.bf16.vlgmr.msra.gmra.mrb[0].mxu0 %vm193_vm1, %v186_v5  ;;  %1966 = vmatmul.mubr.msk.bf16.vlgmr.msra.gmra.mrb[0].mxu1 %vm193_vm1, %v398_v6  ;;  %v491_v13 = vpack.c.bf16 %v1810_v12, %v1810_v12  ;;  %v1812_v15 = vld [vmem:[%s2440_s30 + $0x21] sm:$0xff]  ;;  %v774_v18 = vpack.c.bf16 %v1824_v17, %v1824_v17  ;;  %v1826_v19 = vld [vmem:[%s2440_s30 + $0x31] sm:$0xff] }
  0x1e   : > { %1946 = vmatpush3.bf16.msra.mxu0 %v2446_v3  ;;  %1970 = vmatpush3.bf16.msra.mxu1 %v2446_v3  ;;  %v537_v16 = vpack.c.bf16 %v1812_v15, %v1812_v15  ;;  %v820_v20 = vpack.c.bf16 %v1826_v19, %v1826_v19  ;;  %v1828_v21 = vld [vmem:[%s2440_s30 + $0x40] sm:$0xff]  ;;  %v1842_v25 = vld [vmem:[%s2440_s30 + $0x50] sm:$0xff] }
  0x1f   : > { %1947 = vmatprep.mubr.msk.bf16.mxu0 %vm2348_vm0, %v2347_v1  ;;  %1951 = vmatprep.subr.bf16.mxu0 %v2347_v1  ;;  %v867_v22 = vpack.c.bf16 %v1828_v21, %v1828_v21  ;;  %v1830_v23 = vld [vmem:[%s2440_s30 + $0x41] sm:$0xff]  ;;  %v1150_v26 = vpack.c.bf16 %v1842_v25, %v1842_v25  ;;  %v1844_v27 = vld [vmem:[%s2440_s30 + $0x51] sm:$0xff] }
  0x20   : > { %1971 = vmatprep.mubr.msk.bf16.mxu1 %vm2348_vm0, %v2347_v1  ;;  %1975 = vmatprep.subr.bf16.mxu1 %v2347_v1  ;;  %v913_v24 = vpack.c.bf16 %v1830_v23, %v1830_v23  ;;  %v1196_v28 = vpack.c.bf16 %v1844_v27, %v1844_v27  ;;  %v1846_v29 = vld [vmem:[%s2440_s30 + $0x60] sm:$0xff]  ;;  %v1860_v33 = vld [vmem:[%s2440_s30 + $0x70] sm:$0xff] }
  0x21   : > { %v1243_v30 = vpack.c.bf16 %v1846_v29, %v1846_v29  ;;  %v1848_v31 = vld [vmem:[%s2440_s30 + $0x61] sm:$0xff]  ;;  %v1526_v34 = vpack.c.bf16 %v1860_v33, %v1860_v33  ;;  %v1862_v35 = vld [vmem:[%s2440_s30 + $0x71] sm:$0xff] }
  0x22   : > { %v1289_v32 = vpack.c.bf16 %v1848_v31, %v1848_v31  ;;  %v1572_v36 = vpack.c.bf16 %v1862_v35, %v1862_v35  ;;  %v1864_v37 = vld [vmem:[%s2440_s30 + $0x80] sm:$0xff] }
  0x23   : > { %v1619_v38 = vpack.c.bf16 %v1864_v37, %v1864_v37  ;;  %v1866_v39 = vld [vmem:[%s2440_s30 + $0x81] sm:$0xff]  ;;  %s2349_s30 = smov [#allocation2]  }
  0x24   : > { %v1665_v40 = vpack.c.bf16 %v1866_v39, %v1866_v39  ;;  %s2287_s4 = sshll.u32 %s2349_s30, 4  ;;  %s2288_s4 = int_to_ptr.vmem [resolvable:$false] %s2287_s4 }
  0x25   : > { %s2289_s5 = scalar_lea.vmem %s2288_s4, 2048  ;;  %p2290_p0 = scmp.lt.s32.totalorder %s2646_s25, %s2288_s4 }
  0x26   : > { %p2291_p1 = scmp.lt.s32.totalorder %s2289_s5, %s2283_s29 }
  0x28   : > { %p2292_p2 = por %p2291_p1, %p2290_p0 }
  0x29   : > { %1948 = vmatmul.mubr.msk.bf16.vlgmr.msra.gmra.mrb[0].mxu0 %vm193_vm1, %v239_v9  ;;  %1972 = vmatmul.mubr.msk.bf16.vlgmr.msra.gmra.mrb[0].mxu1 %vm193_vm1, %v444_v10 }
  0x2a   : > { %1952 = vmatpush3.bf16.msra.mxu0 %v2464_v11  ;;  %1976 = vmatpush3.bf16.msra.mxu1 %v2464_v11  ;;  %p2293_p3 = pnand %p2292_p2, %p2286_p13 }
  0x2b   : > { %1953 = vmatprep.mubr.msk.bf16.mxu0 %vm2348_vm0, %v2347_v1  ;;  %1957 = vmatprep.subr.bf16.mxu0 %v2347_v1 }
  0x2c   : > { %1977 = vmatprep.mubr.msk.bf16.mxu1 %vm2348_vm0, %v2347_v1  ;;  %1981 = vmatprep.subr.bf16.mxu1 %v2347_v1 }
  0x35   : > { %1954 = vmatmul.mubr.msk.bf16.vlgmr.msra.gmra.mrb[0].mxu0 %vm193_vm1, %v398_v6  ;;  %1978 = vmatmul.mubr.msk.bf16.vlgmr.msra.gmra.mrb[0].mxu1 %vm193_vm1, %v491_v13 }
  0x36   : > { %1958 = vmatpush3.bf16.msra.mxu0 %v2480_v14  ;;  %1982 = vmatpush3.bf16.msra.mxu1 %v2480_v14 }
  0x37   : > { %1959 = vmatprep.mubr.msk.bf16.mxu0 %vm2348_vm0, %v2347_v1  ;;  %1983 = vmatprep.mubr.msk.bf16.mxu1 %vm2348_vm0, %v2347_v1 }
  0x38   : > { %1987 = vmatprep.subr.bf16.mxu0 %v2347_v1  ;;  %2011 = vmatprep.subr.bf16.mxu1 %v2347_v1 }
  0x41   : > { %1960 = vmatmul.mubr.msk.bf16.vlgmr.msra.gmra.mrb[0].mxu0 %vm193_vm1, %v444_v10  ;;  %1984 = vmatmul.mubr.msk.bf16.vlgmr.msra.gmra.mrb[0].mxu1 %vm193_vm1, %v537_v16 }
  0x42   : > { %1988 = vmatpush3.bf16.msra.mxu0 %v2423_v0  ;;  %2012 = vmatpush3.bf16.msra.mxu1 %v2423_v0 }
  0x43   : > { %1989 = vmatprep.mubr.msk.bf16.mxu0 %vm2348_vm0, %v2347_v1  ;;  %1993 = vmatprep.subr.bf16.mxu0 %v2347_v1 }
  0x44   : > { %2013 = vmatprep.mubr.msk.bf16.mxu1 %vm2348_vm0, %v2347_v1  ;;  %2017 = vmatprep.subr.bf16.mxu1 %v2347_v1 }
  0x49   : > { %1990 = vmatmul.mubr.msk.bf16.vlgmr.msra.gmra.mrb[4].mxu0 %vm193_vm1, %v491_v13  ;;  %2014 = vmatmul.mubr.msk.bf16.vlgmr.msra.gmra.mrb[4].mxu1 %vm193_vm1, %v774_v18 }
  0x4a   : > { %1994 = vmatpush3.bf16.msra.mxu0 %v2446_v3  ;;  %2018 = vmatpush3.bf16.msra.mxu1 %v2446_v3 }
  0x4b   : > { %1995 = vmatprep.mubr.msk.bf16.mxu0 %vm2348_vm0, %v2347_v1  ;;  %1999 = vmatprep.subr.bf16.mxu0 %v2347_v1 }
  0x4c   : > { %2019 = vmatprep.mubr.msk.bf16.mxu1 %vm2348_vm0, %v2347_v1  ;;  %2023 = vmatprep.subr.bf16.mxu1 %v2347_v1 }
  0x55   : > { %1996 = vmatmul.mubr.msk.bf16.vlgmr.msra.gmra.mrb[4].mxu0 %vm193_vm1, %v537_v16  ;;  %2020 = vmatmul.mubr.msk.bf16.vlgmr.msra.gmra.mrb[4].mxu1 %vm193_vm1, %v820_v20 }
  0x56   : > { %2000 = vmatpush3.bf16.msra.mxu0 %v2464_v11  ;;  %2024 = vmatpush3.bf16.msra.mxu1 %v2464_v11 }
  0x57   : > { %2001 = vmatprep.mubr.msk.bf16.mxu0 %vm2348_vm0, %v2347_v1  ;;  %2005 = vmatprep.subr.bf16.mxu0 %v2347_v1 }
  0x58   : > { %2025 = vmatprep.mubr.msk.bf16.mxu1 %vm2348_vm0, %v2347_v1  ;;  %2029 = vmatprep.subr.bf16.mxu1 %v2347_v1 }
  0x61   : > { %2002 = vmatmul.mubr.msk.bf16.vlgmr.msra.gmra.mrb[4].mxu0 %vm193_vm1, %v774_v18  ;;  %2026 = vmatmul.mubr.msk.bf16.vlgmr.msra.gmra.mrb[4].mxu1 %vm193_vm1, %v867_v22 }
  0x62   : > { %2006 = vmatpush3.bf16.msra.mxu0 %v2480_v14  ;;  %2030 = vmatpush3.bf16.msra.mxu1 %v2480_v14 }
  0x63   : > { %2007 = vmatprep.mubr.msk.bf16.mxu0 %vm2348_vm0, %v2347_v1  ;;  %2031 = vmatprep.mubr.msk.bf16.mxu1 %vm2348_vm0, %v2347_v1 }
  0x64   : > { %2035 = vmatprep.subr.bf16.mxu0 %v2347_v1  ;;  %2059 = vmatprep.subr.bf16.mxu1 %v2347_v1 }
  0x6d   : > { %2008 = vmatmul.mubr.msk.bf16.vlgmr.msra.gmra.mrb[4].mxu0 %vm193_vm1, %v820_v20  ;;  %2032 = vmatmul.mubr.msk.bf16.vlgmr.msra.gmra.mrb[4].mxu1 %vm193_vm1, %v913_v24 }
  0x6e   : > { %2036 = vmatpush3.bf16.msra.mxu0 %v2423_v0  ;;  %2060 = vmatpush3.bf16.msra.mxu1 %v2423_v0 }
  0x6f   : > { %2037 = vmatprep.mubr.msk.bf16.mxu0 %vm2348_vm0, %v2347_v1  ;;  %2041 = vmatprep.subr.bf16.mxu0 %v2347_v1 }
  0x70   : > { %2061 = vmatprep.mubr.msk.bf16.mxu1 %vm2348_vm0, %v2347_v1  ;;  %2065 = vmatprep.subr.bf16.mxu1 %v2347_v1 }
  0x75   : > { %2038 = vmatmul.mubr.msk.bf16.vlgmr.msra.gmra.mrb[8].mxu0 %vm193_vm1, %v867_v22  ;;  %2062 = vmatmul.mubr.msk.bf16.vlgmr.msra.gmra.mrb[8].mxu1 %vm193_vm1, %v1150_v26 }
  0x76   : > { %2042 = vmatpush3.bf16.msra.mxu0 %v2446_v3  ;;  %2066 = vmatpush3.bf16.msra.mxu1 %v2446_v3 }
  0x77   : > { %2043 = vmatprep.mubr.msk.bf16.mxu0 %vm2348_vm0, %v2347_v1  ;;  %2047 = vmatprep.subr.bf16.mxu0 %v2347_v1 }
  0x78   : > { %2067 = vmatprep.mubr.msk.bf16.mxu1 %vm2348_vm0, %v2347_v1  ;;  %2071 = vmatprep.subr.bf16.mxu1 %v2347_v1 }
  0x81   : > { %2044 = vmatmul.mubr.msk.bf16.vlgmr.msra.gmra.mrb[8].mxu0 %vm193_vm1, %v913_v24  ;;  %2068 = vmatmul.mubr.msk.bf16.vlgmr.msra.gmra.mrb[8].mxu1 %vm193_vm1, %v1196_v28 }
  0x82   : > { %2048 = vmatpush3.bf16.msra.mxu0 %v2464_v11  ;;  %2072 = vmatpush3.bf16.msra.mxu1 %v2464_v11 }
  0x83   : > { %2049 = vmatprep.mubr.msk.bf16.mxu0 %vm2348_vm0, %v2347_v1  ;;  %2053 = vmatprep.subr.bf16.mxu0 %v2347_v1 }
  0x84   : > { %2073 = vmatprep.mubr.msk.bf16.mxu1 %vm2348_vm0, %v2347_v1  ;;  %2077 = vmatprep.subr.bf16.mxu1 %v2347_v1 }
  0x8d   : > { %2050 = vmatmul.mubr.msk.bf16.vlgmr.msra.gmra.mrb[8].mxu0 %vm193_vm1, %v1150_v26  ;;  %2074 = vmatmul.mubr.msk.bf16.vlgmr.msra.gmra.mrb[8].mxu1 %vm193_vm1, %v1243_v30 }
  0x8e   : > { %2054 = vmatpush3.bf16.msra.mxu0 %v2480_v14  ;;  %2078 = vmatpush3.bf16.msra.mxu1 %v2480_v14 }
  0x8f   : > { %2055 = vmatprep.mubr.msk.bf16.mxu0 %vm2348_vm0, %v2347_v1  ;;  %2079 = vmatprep.mubr.msk.bf16.mxu1 %vm2348_vm0, %v2347_v1 }
  0x90   : > { %2083 = vmatprep.subr.bf16.mxu0 %v2347_v1  ;;  %2107 = vmatprep.subr.bf16.mxu1 %v2347_v1 }
  0x99   : > { %2056 = vmatmul.mubr.msk.bf16.vlgmr.msra.gmra.mrb[8].mxu0 %vm193_vm1, %v1196_v28  ;;  %2080 = vmatmul.mubr.msk.bf16.vlgmr.msra.gmra.mrb[8].mxu1 %vm193_vm1, %v1289_v32 }
  0x9a   : > { %2084 = vmatpush3.bf16.msra.mxu0 %v2423_v0  ;;  %2108 = vmatpush3.bf16.msra.mxu1 %v2423_v0 }
  0x9b   : > { %2085 = vmatprep.mubr.msk.bf16.mxu0 %vm2348_vm0, %v2347_v1  ;;  %2089 = vmatprep.subr.bf16.mxu0 %v2347_v1 }
  0x9c   : > { %2109 = vmatprep.mubr.msk.bf16.mxu1 %vm2348_vm0, %v2347_v1  ;;  %2113 = vmatprep.subr.bf16.mxu1 %v2347_v1 }
  0xa1   : > { %2086 = vmatmul.mubr.msk.bf16.vlgmr.msra.gmra.mrb[12].mxu0 %vm193_vm1, %v1243_v30  ;;  %2110 = vmatmul.mubr.msk.bf16.vlgmr.msra.gmra.mrb[12].mxu1 %vm193_vm1, %v1526_v34 }
  0xa2   : > { %2090 = vmatpush3.bf16.msra.mxu0 %v2446_v3  ;;  %2114 = vmatpush3.bf16.msra.mxu1 %v2446_v3 }
  0xa3   : > { %2091 = vmatprep.mubr.msk.bf16.mxu0 %vm2348_vm0, %v2347_v1  ;;  %2095 = vmatprep.subr.bf16.mxu0 %v2347_v1 }
  0xa4   : > { %2115 = vmatprep.mubr.msk.bf16.mxu1 %vm2348_vm0, %v2347_v1  ;;  %2119 = vmatprep.subr.bf16.mxu1 %v2347_v1 }
  0xad   : > { %2092 = vmatmul.mubr.msk.bf16.vlgmr.msra.gmra.mrb[12].mxu0 %vm193_vm1, %v1289_v32  ;;  %2116 = vmatmul.mubr.msk.bf16.vlgmr.msra.gmra.mrb[12].mxu1 %vm193_vm1, %v1572_v36 }
  0xae   : > { %2096 = vmatpush3.bf16.msra.mxu0 %v2464_v11  ;;  %2120 = vmatpush3.bf16.msra.mxu1 %v2464_v11 }
  0xaf   : > { %2097 = vmatprep.mubr.msk.bf16.mxu0 %vm2348_vm0, %v2347_v1  ;;  %2101 = vmatprep.subr.bf16.mxu0 %v2347_v1 }
  0xb0   : > { %2121 = vmatprep.mubr.msk.bf16.mxu1 %vm2348_vm0, %v2347_v1  ;;  %2125 = vmatprep.subr.bf16.mxu1 %v2347_v1 }
  0xb9   : > { %2098 = vmatmul.mubr.msk.bf16.vlgmr.msra.gmra.mrb[12].mxu0 %vm193_vm1, %v1526_v34  ;;  %2122 = vmatmul.mubr.msk.bf16.vlgmr.msra.gmra.mrb[12].mxu1 %vm193_vm1, %v1619_v38 }
  0xba   : > { %2102 = vmatpush3.bf16.msra.mxu0 %v2480_v14  ;;  %2126 = vmatpush3.bf16.msra.mxu1 %v2480_v14 }
  0xbb   : > { %2103 = vmatprep.mubr.msk.bf16.mxu0 %vm2348_vm0, %v2347_v1  ;;  %2127 = vmatprep.mubr.msk.bf16.mxu1 %vm2348_vm0, %v2347_v1 }
  0xc5   : > { %2104 = vmatmul.mubr.msk.bf16.vlgmr.msra.gmra.mrb[12].mxu0 %vm193_vm1, %v1572_v36  ;;  %2128 = vmatmul.mubr.msk.bf16.vlgmr.msra.gmra.mrb[12].mxu1 %vm193_vm1, %v1665_v40 }
 0x114   : > { %v388_v42 = vpop.f32.mrb[0].mxu0  ;;  %v575_v43 = vpop.f32.mrb[0].mxu1 }
 0x115   : > { %v2131_v44 = vadd.f32 %v1795_v41, %v388_v42  ;;  %v2132_v45 = vadd.f32 %v1795_v41, %v575_v43  ;;  %v1961_v46 = vpop.f32.mrb[1].mxu0  ;;  %v1985_v47 = vpop.f32.mrb[1].mxu1 }
 0x116   : > { %v391_v48 = vpop.f32.mrb[2].mxu0  ;;  %v578_v49 = vpop.f32.mrb[2].mxu1 }
 0x117   : > { %v395_v50 = vmax.f32 %v2131_v44, 0.0  ;;  %v582_v51 = vmax.f32 %v2132_v45, 0.0  ;;  %v1962_v52 = vpop.f32.mrb[3].mxu0  ;;  %v1986_v53 = vpop.f32.mrb[3].mxu1 }
 0x119   : > { %396 = vst [vmem:[%s2631_s20] sm:$0xff] %v395_v50  ;;  %1814 = vst [vmem:[%s2631_s20 + $0x8] sm:$0xff] %v582_v51 }
 0x140   : > { %v763_v54 = vpop.f32.mrb[4].mxu0  ;;  %v951_v55 = vpop.f32.mrb[4].mxu1 }
 0x141   : > { %v2133_v56 = vadd.f32 %v1795_v41, %v763_v54  ;;  %v2134_v57 = vadd.f32 %v1795_v41, %v951_v55  ;;  %v2009_v58 = vpop.f32.mrb[5].mxu0  ;;  %v2033_v59 = vpop.f32.mrb[5].mxu1 }
 0x142   : > { %v766_v60 = vpop.f32.mrb[6].mxu0  ;;  %v954_v61 = vpop.f32.mrb[6].mxu1 }
 0x143   : > { %v770_v62 = vmax.f32 %v2133_v56, 0.0  ;;  %v958_v63 = vmax.f32 %v2134_v57, 0.0  ;;  %v2010_v0 = vpop.f32.mrb[7].mxu0  ;;  %v2034_v1 = vpop.f32.mrb[7].mxu1 }
 0x145   : > { %1823 = vst [vmem:[%s2631_s20 + $0x10] sm:$0xff] %v770_v62  ;;  %1832 = vst [vmem:[%s2631_s20 + $0x18] sm:$0xff] %v958_v63 }
 0x16c   : > { %v1139_v2 = vpop.f32.mrb[8].mxu0  ;;  %v1327_v3 = vpop.f32.mrb[8].mxu1 }
 0x16d   : > { %v2135_v4 = vadd.f32 %v1795_v41, %v1139_v2  ;;  %v2136_v5 = vadd.f32 %v1795_v41, %v1327_v3  ;;  %v2057_v6 = vpop.f32.mrb[9].mxu0  ;;  %v2081_v7 = vpop.f32.mrb[9].mxu1 }
 0x16e   : > { %v1142_v8 = vpop.f32.mrb[10].mxu0  ;;  %v1330_v9 = vpop.f32.mrb[10].mxu1 }
 0x16f   : > { %v1146_v10 = vmax.f32 %v2135_v4, 0.0  ;;  %v1334_v11 = vmax.f32 %v2136_v5, 0.0  ;;  %v2058_v12 = vpop.f32.mrb[11].mxu0  ;;  %v2082_v13 = vpop.f32.mrb[11].mxu1 }
 0x171   : > { %1841 = vst [vmem:[%s2631_s20 + $0x20] sm:$0xff] %v1146_v10  ;;  %1850 = vst [vmem:[%s2631_s20 + $0x28] sm:$0xff] %v1334_v11 }
 0x198   : > { %v1515_v14 = vpop.f32.mrb[12].mxu0  ;;  %v1703_v15 = vpop.f32.mrb[12].mxu1 }
 0x199   : > { %v2137_v16 = vadd.f32 %v1795_v41, %v1515_v14  ;;  %v2138_v17 = vadd.f32 %v1795_v41, %v1703_v15  ;;  %v2105_v18 = vpop.f32.mrb[13].mxu0  ;;  %v2129_v19 = vpop.f32.mrb[13].mxu1 }
 0x19a   : > { %v1518_v20 = vpop.f32.mrb[14].mxu0  ;;  %v1706_v21 = vpop.f32.mrb[14].mxu1 }
 0x19b   : > { %v1522_v22 = vmax.f32 %v2137_v16, 0.0  ;;  %v1710_v23 = vmax.f32 %v2138_v17, 0.0  ;;  %v2106_v24 = vpop.f32.mrb[15].mxu0  ;;  %v2130_v25 = vpop.f32.mrb[15].mxu1 }
 0x19d   : > { %1859 = vst [vmem:[%s2631_s20 + $0x30] sm:$0xff] %v1522_v22  ;;  %1868 = vst [vmem:[%s2631_s20 + $0x38] sm:$0xff] %v1710_v23 }
 0x19e   : > { %2296 = shalt.err (!%p2293_p3)
}
 0x19f   : > { %s2297_s6 = scalar_lea.hbm %s2644_s28, 1024  ;;  %s2301_s9 = scalar_lea.hbm %s2696_s3, 2048 }
 0x1a0   : > { %p2298_p4 = scmp.ne.s32.totalorder %s2644_s28, %s2297_s6  ;;  %p2302_p9 = scmp.lt.u32.totalorder %s2644_s28, %s2696_s3 }
 0x1a1   : > { %p2303_p10 = scmp.lt.u32.totalorder %s2301_s9, %s2297_s6  ;;  %p2305_p12 = scmp.lt.u32.totalorder %s2297_s6, %s2644_s28 }
 0x1a2   : > { %p2299_p7 = pnand %p2298_p4, %p2410_p5 }
 0x1a3   : > { %p2304_p11 = por %p2303_p10, %p2302_p9 }
 0x1a4   : > { %p2300_p8 = pneg %p2299_p7 }
 0x1a5   : > { %p2306_p13 = por %p2305_p12, %p2304_p11 }
 0x1a7   : > { %p2307_p0 = pnand %p2306_p13, %p2300_p8 }
 0x1a9   : > { %2310 = shalt.err (!%p2307_p0)
}
 0x1aa   : > { %s2350_s17 = smov 128   ;;  %s2351_s19 = smov 8  }
 0x1ab   : > { %2236 = dma.vmem_to_hbm [thread:$0]  (%p2410_p5), %s2646_s25, 1024, %s2644_s28, %s2652_s16, %s2350_s17, %s2350_s17, %s2351_s19  }
 0x1ac PF: > { %p2242_p1 = scmp.ge.s32.totalorder %s2345_s15, 2  ;;  %s1742_s20 = sand.u32 1, %s2333_s12  }
 0x1ad   : > { %s1743_s24 = scalar_lea.sflag [#allocation3], %s1742_s20 }
 0x1ae   : > { %p2239_p2 = pnand %p2242_p1, %p2414_p6 }
 0x1b0   : > { %2328 = dma.done.wait (!%p2239_p2), %s1743_s24, 1024  }
 0x1b1   : > { %2330 = vsyncadd (!%p2239_p2), %s1743_s24, 4294966272  ;;  %p13_p3 = scmp.ge.s32.totalorder %s2397_s18, 4   ;;  %s2699_s12 = smov %s2337_s13 }
 0x1b2   : > { %s2700_s13 = smov %s2341_s14  ;;  %s2701_s14 = smov %s2408_s21 }
 0x1b3   : > { %s2702_s15 = smov %s2397_s18  ;;  %15 = sbr.rel (!%p13_p3) target bundleno = 3 (0x3), region = 82 }
 0x1ba   :  { %1748 = vsyncpa [#allocation3], 1 }
 0x1bb   :  { %1750 = vsyncpa [#allocation3 + $0x1], 1 }

</bundles_post_ra>
